<compile_context>
chip_gen: v7x
topology: tpu7x:2x2x1
jax: 0.10.0
libtpu: 0.0.40
codegen_flags: <defaults>
</compile_context>

<pallas_src>
import jax
import jax.numpy as jnp
import numpy as np
from jax.experimental import pallas as pl
from jax.experimental.pallas import tpu as pltpu


# ----------------------------- Pallas kernels -----------------------------
# All kernels see activation tiles of shape (C, TM) (C on sublanes, H*W chunk on lanes)
# and write an output tile (Cout, TM).  Every column is independent, so partial (masked)
# edge blocks are safe.

def _fused_sum_kernel(x1_ref, x2_ref, w1_ref, w2_ref, b1_ref, b2_ref, o_ref):
    """relu(w1 @ x1 + b1) + relu(w2 @ x2 + b2)   (both branches + add, one kernel)."""
    x1 = x1_ref[...].astype(jnp.bfloat16)
    x2 = x2_ref[...].astype(jnp.bfloat16)
    y1 = jnp.dot(w1_ref[...], x1, preferred_element_type=jnp.float32)
    y1 = jnp.maximum(y1 + b1_ref[...], 0.0)
    y2 = jnp.dot(w2_ref[...], x2, preferred_element_type=jnp.float32)
    y2 = jnp.maximum(y2 + b2_ref[...], 0.0)
    o_ref[...] = (y1 + y2).astype(o_ref.dtype)


def _fused_concat_kernel(x1_ref, x2_ref, w1_ref, w2_ref, b1_ref, b2_ref,
                         wt_ref, wb_ref, bc_ref, o_ref):
    """conv1x1(concat(branch1(x1), branch2(x2))) without materializing the concat."""
    x1 = x1_ref[...].astype(jnp.bfloat16)
    x2 = x2_ref[...].astype(jnp.bfloat16)
    y1 = jnp.maximum(jnp.dot(w1_ref[...], x1, preferred_element_type=jnp.float32)
                     + b1_ref[...], 0.0).astype(jnp.bfloat16)
    y2 = jnp.maximum(jnp.dot(w2_ref[...], x2, preferred_element_type=jnp.float32)
                     + b2_ref[...], 0.0).astype(jnp.bfloat16)
    z = jnp.dot(wt_ref[...], y1, preferred_element_type=jnp.float32)
    z = z + jnp.dot(wb_ref[...], y2, preferred_element_type=jnp.float32)
    o_ref[...] = jnp.maximum(z + bc_ref[...], 0.0).astype(o_ref.dtype)


def _concat_conv_kernel(x1_ref, x2_ref, wt_ref, wb_ref, b_ref, o_ref):
    """relu(wt @ x1 + wb @ x2 + b)  — conv1x1 over a virtual channel-concat."""
    x1 = x1_ref[...].astype(jnp.bfloat16)
    x2 = x2_ref[...].astype(jnp.bfloat16)
    y = jnp.dot(wt_ref[...], x1, preferred_element_type=jnp.float32)
    y = y + jnp.dot(wb_ref[...], x2, preferred_element_type=jnp.float32)
    o_ref[...] = jnp.maximum(y + b_ref[...], 0.0).astype(o_ref.dtype)


def _branch_kernel(x_ref, w_ref, b_ref, o_ref):
    """Single conv_bn_relu (1x1): relu(w @ x + b)."""
    x = x_ref[...].astype(jnp.bfloat16)
    y = jnp.dot(w_ref[...], x, preferred_element_type=jnp.float32)
    o_ref[...] = jnp.maximum(y + b_ref[...], 0.0).astype(o_ref.dtype)


def _branch_sum_kernel(xb_ref, other_ref, w_ref, b_ref, o_ref):
    """relu(w @ x_big + b) + other   (high-res branch conv fused with the final add)."""
    xb = xb_ref[...].astype(jnp.bfloat16)
    y = jnp.dot(w_ref[...], xb, preferred_element_type=jnp.float32)
    y = jnp.maximum(y + b_ref[...], 0.0)
    o_ref[...] = (y + other_ref[...].astype(jnp.float32)).astype(o_ref.dtype)


def _branch_concat_conv_kernel(xb_ref, other_ref, w_ref, b_ref,
                               w_big_ref, w_oth_ref, bc_ref, o_ref):
    """relu(w_big @ relu(w@x_big+b) + w_oth @ other + bc): high-res branch conv fused with
    the conv1x1 over the virtual concat (the other branch is already upsampled)."""
    xb = xb_ref[...].astype(jnp.bfloat16)
    y = jnp.maximum(jnp.dot(w_ref[...], xb, preferred_element_type=jnp.float32)
                    + b_ref[...], 0.0).astype(jnp.bfloat16)
    oth = other_ref[...].astype(jnp.bfloat16)
    z = jnp.dot(w_big_ref[...], y, preferred_element_type=jnp.float32)
    z = z + jnp.dot(w_oth_ref[...], oth, preferred_element_type=jnp.float32)
    o_ref[...] = jnp.maximum(z + bc_ref[...], 0.0).astype(o_ref.dtype)


def _add_kernel(x1_ref, x2_ref, o_ref):
    o_ref[...] = (x1_ref[...] + x2_ref[...]).astype(o_ref.dtype)


# --------------------------- pallas_call wrapper ---------------------------

_MAX_TM = 2048
_TILE_VMEM_BUDGET = 24 << 20       # keeps working set well under v7x's 64 MiB per-TC VMEM


def _round_up(x, m):
    return ((x + m - 1) // m) * m


def _pick_tm(hw, n, lane_bytes):
    """Fixed 128-aligned lane tile, VMEM-budgeted; ragged last block is masked by Pallas."""
    if hw <= 128:
        return hw                                   # full-extent lane block (always legal)
    cap = max(128, (_TILE_VMEM_BUDGET // max(lane_bytes, 1)) // 128 * 128)
    tm = min(_MAX_TM, cap, (hw // 128) * 128)
    # keep >= 2 grid steps across the parallel axes so both v7x TensorCores get work
    if n * pl.cdiv(hw, tm) < 2:
        tm = max(128, _round_up(pl.cdiv(hw, 2), 128))
    return tm


def _call_fused(kernel, acts, params, cout, out_dtype):
    """acts: list of (N, C_i, HW) arrays (native dtype) tiled along HW (lane axis);
    params: small 2-D arrays (weights / biases) broadcast to every tile."""
    n, _, hw = acts[0].shape
    out_dtype = np.dtype(out_dtype)

    # Per-lane-column VMEM footprint: double-buffered act tiles + in-kernel bf16 copies
    # + double-buffered out tile + f32 accumulators / bf16 staging (worst-case kernel).
    lane_bytes = sum(a.shape[1] * (2 * a.dtype.itemsize + 2) for a in acts)
    lane_bytes += cout * (2 * out_dtype.itemsize + 3 * 4 + 2 * 2)

    tm = _pick_tm(hw, n, lane_bytes)
    grid = (n, pl.cdiv(hw, tm))

    param_bytes = sum(int(p.size) * p.dtype.itemsize for p in params)
    vmem_limit = int(lane_bytes * tm * 3 // 2) + 2 * param_bytes + (4 << 20)
    vmem_limit = min(max(vmem_limit, 16 << 20), 48 << 20)

    act_specs = [pl.BlockSpec((None, a.shape[1], tm), lambda b, i: (b, 0, i))
                 for a in acts]
    param_specs = [pl.BlockSpec(p.shape, lambda b, i: (0, 0)) for p in params]
    out_spec = pl.BlockSpec((None, cout, tm), lambda b, i: (b, 0, i))

    return pl.pallas_call(
        kernel,
        out_shape=jax.ShapeDtypeStruct((n, cout, hw), out_dtype),
        grid=grid,
        in_specs=act_specs + param_specs,
        out_specs=out_spec,
        compiler_params=pltpu.CompilerParams(
            dimension_semantics=("parallel", "parallel"),
            vmem_limit_bytes=vmem_limit),
    )(*acts, *params)


# --------------------------- plain-JAX glue helpers ---------------------------

def _bilinear_align_corners_nchw(x, out_h, out_w):
    """nn.Upsample(mode='bilinear', align_corners=True) equivalent, NCHW, plain JAX.

    # TODO(synk): data-dependent gather of bilinear upsampling kept in plain JAX
    # (no clean rectangular-tile Pallas equivalent); the conv / add hot path stays in kernels.
    """
    n, c, h, w = x.shape
    if (h, w) == (out_h, out_w):
        return x
    ys = jnp.linspace(0.0, h - 1.0, out_h) if out_h > 1 else jnp.zeros((1,), jnp.float32)
    xs = jnp.linspace(0.0, w - 1.0, out_w) if out_w > 1 else jnp.zeros((1,), jnp.float32)
    y0 = jnp.floor(ys).astype(jnp.int32)
    x0 = jnp.floor(xs).astype(jnp.int32)
    y1 = jnp.minimum(y0 + 1, h - 1)
    x1 = jnp.minimum(x0 + 1, w - 1)
    wy = (ys - y0.astype(jnp.float32)).reshape(1, 1, out_h, 1)
    wx = (xs - x0.astype(jnp.float32)).reshape(1, 1, 1, out_w)

    def gather(yi, xi):
        return x[:, :, yi, :][:, :, :, xi]

    top = gather(y0, x0) * (1.0 - wx) + gather(y0, x1) * wx
    bot = gather(y1, x0) * (1.0 - wx) + gather(y1, x1) * wx
    return top * (1.0 - wy) + bot * wy


def _init_conv_bn(key, cin, cout, eps=1e-5):
    """Random conv(1x1)+BN(eval) parameters; BN scale folded into the weight.
    Returns w_folded (Cout, Cin) bf16 and bias (Cout, 1) f32."""
    kw, kg, kb, km, kv = jax.random.split(key, 5)
    w = jax.random.normal(kw, (cout, cin), jnp.float32) / jnp.sqrt(float(cin))
    gamma = 1.0 + 0.1 * jax.random.normal(kg, (cout,), jnp.float32)
    beta = 0.1 * jax.random.normal(kb, (cout,), jnp.float32)
    mean = 0.1 * jax.random.normal(km, (cout,), jnp.float32)
    var = 1.0 + 0.1 * jax.nn.softplus(jax.random.normal(kv, (cout,), jnp.float32))
    scale = gamma / jnp.sqrt(var + eps)
    bias = beta - mean * scale
    w_folded = (w * scale[:, None]).astype(jnp.bfloat16)
    return w_folded, bias.reshape(cout, 1).astype(jnp.float32)


# ------------------------------- AggregateCell -------------------------------

class AggregateCell:
    """JAX/Pallas port of the PyTorch AggregateCell (BN in eval mode, folded)."""

    def __init__(self, key, size_1, size_2, agg_size, pre_transform=True,
                 concat=False, out_dtype=None):
        self.pre_transform = pre_transform
        self.concat = concat
        self.agg_size = agg_size
        self.out_dtype = out_dtype          # None -> follow the input dtype
        k1, k2, k3 = jax.random.split(key, 3)
        if pre_transform:
            self.w1, self.b1 = _init_conv_bn(k1, size_1, agg_size)
            self.w2, self.b2 = _init_conv_bn(k2, size_2, agg_size)
        if concat:
            self.wc, self.bc = _init_conv_bn(k3, agg_size * 2, agg_size)

    def __call__(self, x1_nchw, x2_nchw):
        n, c1, h1, w1 = x1_nchw.shape
        _, c2, h2, w2 = x2_nchw.shape
        out_dtype = self.out_dtype if self.out_dtype is not None else x1_nchw.dtype
        same = (h1, w1) == (h2, w2)

        # Activations stay in their native dtype (no wrapper-side upcast) and in NCHW
        # viewed as (N, C, H*W): H*W on the lane axis, free reshape.
        x1 = x1_nchw.reshape(n, c1, h1 * w1)
        x2 = x2_nchw.reshape(n, c2, h2 * w2)

        # ---- fully fused fast paths (matching spatial sizes, pre_transform) ----
        if self.pre_transform and same:
            if self.concat:
                wt = self.wc[:, :self.agg_size]
                wb = self.wc[:, self.agg_size:]
                out = _call_fused(
                    _fused_concat_kernel, [x1, x2],
                    [self.w1, self.w2, self.b1, self.b2, wt, wb, self.bc],
                    self.agg_size, out_dtype)
            else:
                out = _call_fused(
                    _fused_sum_kernel, [x1, x2],
                    [self.w1, self.w2, self.b1, self.b2],
                    self.agg_size, out_dtype)
            return out.reshape(n, self.agg_size, h1, w1)

        # Which input keeps its resolution (torch.Size lexicographic comparison — same
        # semantics as the PyTorch module, including mixed h/w orderings).
        if same or (h1, w1) > (h2, w2):
            big_is_x1, oh, ow = True, h1, w1
        else:
            big_is_x1, oh, ow = False, h2, w2
        ohw = oh * ow

        if self.pre_transform:
            # pre_transform with mismatched sizes: run the low-res branch conv (bf16 out),
            # bilinear-upsample it, then fuse the high-res branch conv with the final op so
            # the largest intermediate never round-trips HBM.
            if big_is_x1:
                small = _call_fused(_branch_kernel, [x2], [self.w2, self.b2],
                                    self.agg_size, jnp.bfloat16)
                small = small.reshape(n, self.agg_size, h2, w2)
                x_big, w_big, b_big = x1, self.w1, self.b1
            else:
                small = _call_fused(_branch_kernel, [x1], [self.w1, self.b1],
                                    self.agg_size, jnp.bfloat16)
                small = small.reshape(n, self.agg_size, h1, w1)
                x_big, w_big, b_big = x2, self.w2, self.b2
            other = _bilinear_align_corners_nchw(small, oh, ow)
            other = other.astype(jnp.bfloat16).reshape(n, self.agg_size, ohw)

            if self.concat:
                wt = self.wc[:, :self.agg_size]
                wb = self.wc[:, self.agg_size:]
                w_big_slot, w_oth_slot = (wt, wb) if big_is_x1 else (wb, wt)
                out = _call_fused(
                    _branch_concat_conv_kernel, [x_big, other],
                    [w_big, b_big, w_big_slot, w_oth_slot, self.bc],
                    self.agg_size, out_dtype)
            else:
                out = _call_fused(_branch_sum_kernel, [x_big, other],
                                  [w_big, b_big], self.agg_size, out_dtype)
            return out.reshape(n, self.agg_size, oh, ow)

        # ---- no pre_transform ----
        if not same:
            if big_is_x1:
                x2u = _bilinear_align_corners_nchw(x2_nchw, oh, ow)
                x1b, x2b = x1, x2u.reshape(n, c2, ohw)
            else:
                x1u = _bilinear_align_corners_nchw(x1_nchw, oh, ow)
                x1b, x2b = x1u.reshape(n, c1, ohw), x2
        else:
            x1b, x2b = x1, x2

        if self.concat:
            wt = self.wc[:, :c1]
            wb = self.wc[:, c1:]
            out = _call_fused(_concat_conv_kernel, [x1b, x2b],
                              [wt, wb, self.bc], self.agg_size, out_dtype)
            return out.reshape(n, self.agg_size, oh, ow)

        if not same:
            # keep the add in plain JAX so XLA fuses it with the bilinear gather
            return (x1b + x2b).reshape(n, c1, oh, ow).astype(out_dtype)

        out = _call_fused(_add_kernel, [x1b, x2b], [], c1, out_dtype)
        return out.reshape(n, c1, oh, ow)


# --------------------------------- reference ---------------------------------

def _ref_forward(cell, x1, x2):
    """Plain-JAX f32 reference mirroring the PyTorch forward."""
    x1 = x1.astype(jnp.float32)
    x2 = x2.astype(jnp.float32)

    def cbr(x, w, b):
        y = jnp.einsum("oc,nchw->nohw", w.astype(jnp.float32), x,
                       precision=jax.lax.Precision.HIGHEST)
        return jnp.maximum(y + b.reshape(1, -1, 1, 1), 0.0)

    if cell.pre_transform:
        x1 = cbr(x1, cell.w1, cell.b1)
        x2 = cbr(x2, cell.w2, cell.b2)
    s1, s2 = x1.shape[2:], x2.shape[2:]
    if s1 > s2:
        x2 = _bilinear_align_corners_nchw(x2, *s1)
    elif s1 < s2:
        x1 = _bilinear_align_corners_nchw(x1, *s2)
    if cell.concat:
        return cbr(jnp.concatenate([x1, x2], axis=1), cell.wc, cell.bc)
    return x1 + x2


# ------------------------------------ main ------------------------------------

if __name__ == "__main__":
    key = jax.random.PRNGKey(0)
    k_cell, k_cell2, kx1, kx2, kx3 = jax.random.split(key, 5)

    N, agg = 2, 16
    c1, c2 = 4, 8

    x1 = jax.random.normal(kx1, (N, c1, 16, 16), jnp.float32)
    x2 = jax.random.normal(kx2, (N, c2, 16, 16), jnp.float32)

    # 1) same spatial size, pre_transform, sum  (fully fused sum kernel)
    cell_sum = AggregateCell(k_cell, c1, c2, agg, pre_transform=True, concat=False)
    out = jax.block_until_ready(cell_sum(x1, x2))
    ref = _ref_forward(cell_sum, x1, x2)
    assert out.shape == (N, agg, 16, 16)
    assert jnp.allclose(out.astype(jnp.float32), ref, atol=3e-2, rtol=3e-2), "sum mismatch"

    # 2) same spatial size, pre_transform, concat (fused concat kernel, no HBM concat)
    cell_cat = AggregateCell(k_cell2, c1, c2, agg, pre_transform=True, concat=True)
    out = jax.block_until_ready(cell_cat(x1, x2))
    ref = _ref_forward(cell_cat, x1, x2)
    assert jnp.allclose(out.astype(jnp.float32), ref, atol=6e-2, rtol=6e-2), "concat mismatch"

    # 3) different spatial sizes (x2 low-res -> bilinear upsample), fused branch+add
    x2_small = jax.random.normal(kx3, (N, c2, 8, 8), jnp.float32)
    out = jax.block_until_ready(cell_sum(x1, x2_small))
    ref = _ref_forward(cell_sum, x1, x2_small)
    assert out.shape == (N, agg, 16, 16)
    assert jnp.allclose(out.astype(jnp.float32), ref, atol=6e-2, rtol=6e-2), "upsample mismatch"

    # 4) ragged lane dim (hw = 144, not a multiple of 128) exercises the cdiv / masked edge
    x1r = jax.random.normal(kx1, (N, c1, 12, 12), jnp.float32)
    x2r = jax.random.normal(kx2, (N, c2, 12, 12), jnp.float32)
    out = jax.block_until_ready(cell_sum(x1r, x2r))
    ref = _ref_forward(cell_sum, x1r, x2r)
    assert jnp.allclose(out.astype(jnp.float32), ref, atol=3e-2, rtol=3e-2), "ragged mismatch"

    # 5) native bf16 activations: no wrapper upcast, bf16 in -> bf16 out
    out_bf16 = jax.block_until_ready(
        cell_sum(x1.astype(jnp.bfloat16), x2.astype(jnp.bfloat16)))
    assert out_bf16.dtype == jnp.bfloat16
    ref = _ref_forward(cell_sum, x1, x2)
    assert jnp.allclose(out_bf16.astype(jnp.float32), ref, atol=1.5e-1, rtol=1.5e-1), \
        "bf16 path mismatch"

    print("KERNEL_OK")
</pallas_src>

<mosaic_0001>
module attributes {stable_mosaic.version = 11 : i64} {
  func.func @_fused_sum_kernel(%arg0: i32, %arg1: i32, %arg2: memref<1x4x256xf32, #tpu.memory_space<vmem>>, %arg3: memref<1x8x256xf32, #tpu.memory_space<vmem>>, %arg4: memref<16x4xbf16, #tpu.memory_space<vmem>>, %arg5: memref<16x8xbf16, #tpu.memory_space<vmem>>, %arg6: memref<16x1xf32, #tpu.memory_space<vmem>>, %arg7: memref<16x1xf32, #tpu.memory_space<vmem>>, %arg8: memref<1x16x256xf32, #tpu.memory_space<vmem>>) attributes {dimension_semantics = [#tpu.dimension_semantics<parallel>, #tpu.dimension_semantics<parallel>], iteration_bounds = array<i64: 2, 1>, scalar_prefetch = 0 : i64, scratch_operands = 0 : i64, tpu.core_type = #tpu.core_type<tc>, window_params = [{transform_indices = @transform_0, window_bounds = array<i64: 1, 4, 256>}, {transform_indices = @transform_1, window_bounds = array<i64: 1, 8, 256>}, {pipeline_mode = #tpu.pipeline_mode<synchronous>, transform_indices = @transform_2, window_bounds = array<i64: 16, 4>}, {pipeline_mode = #tpu.pipeline_mode<synchronous>, transform_indices = @transform_3, window_bounds = array<i64: 16, 8>}, {pipeline_mode = #tpu.pipeline_mode<synchronous>, transform_indices = @transform_4, window_bounds = array<i64: 16, 1>}, {pipeline_mode = #tpu.pipeline_mode<synchronous>, transform_indices = @transform_5, window_bounds = array<i64: 16, 1>}, {transform_indices = @transform_6, window_bounds = array<i64: 1, 16, 256>}]} {
    %c0 = arith.constant 0 : index
    %c0_0 = arith.constant 0 : index
    %c0_1 = arith.constant 0 : index
    %0 = vector.load %arg2[%c0, %c0_0, %c0_1] : memref<1x4x256xf32, #tpu.memory_space<vmem>>, vector<1x4x256xf32>
    %1 = vector.shape_cast %0 : vector<1x4x256xf32> to vector<4x256xf32>
    %2 = arith.truncf %1 : vector<4x256xf32> to vector<4x256xbf16>
    %c0_2 = arith.constant 0 : index
    %c0_3 = arith.constant 0 : index
    %c0_4 = arith.constant 0 : index
    %3 = vector.load %arg3[%c0_2, %c0_3, %c0_4] : memref<1x8x256xf32, #tpu.memory_space<vmem>>, vector<1x8x256xf32>
    %4 = vector.shape_cast %3 : vector<1x8x256xf32> to vector<8x256xf32>
    %5 = arith.truncf %4 : vector<8x256xf32> to vector<8x256xbf16>
    %c0_5 = arith.constant 0 : index
    %c0_6 = arith.constant 0 : index
    %6 = vector.load %arg4[%c0_5, %c0_6] : memref<16x4xbf16, #tpu.memory_space<vmem>>, vector<16x4xbf16>
    %cst = arith.constant dense<0.000000e+00> : vector<16x256xf32>
    %7 = tpu.matmul %6, %2, %cst {dimension_numbers = #tpu.dot_dimension_numbers<[1], [0], [0], [1], [0, 0, 1, 1], [], []>} : vector<16x4xbf16>, vector<4x256xbf16>, vector<16x256xf32> -> vector<16x256xf32>
    %c0_7 = arith.constant 0 : index
    %c0_8 = arith.constant 0 : index
    %8 = vector.load %arg6[%c0_7, %c0_8] : memref<16x1xf32, #tpu.memory_space<vmem>>, vector<16x1xf32>
    %9 = vector.broadcast %8 : vector<16x1xf32> to vector<16x256xf32>
    %10 = arith.addf %7, %9 : vector<16x256xf32>
    %cst_9 = arith.constant 0.000000e+00 : f32
    %11 = vector.broadcast %cst_9 : f32 to vector<16x256xf32>
    %12 = arith.maximumf %10, %11 : vector<16x256xf32>
    %c0_10 = arith.constant 0 : index
    %c0_11 = arith.constant 0 : index
    %13 = vector.load %arg5[%c0_10, %c0_11] : memref<16x8xbf16, #tpu.memory_space<vmem>>, vector<16x8xbf16>
    %cst_12 = arith.constant dense<0.000000e+00> : vector<16x256xf32>
    %14 = tpu.matmul %13, %5, %cst_12 {dimension_numbers = #tpu.dot_dimension_numbers<[1], [0], [0], [1], [0, 0, 1, 1], [], []>} : vector<16x8xbf16>, vector<8x256xbf16>, vector<16x256xf32> -> vector<16x256xf32>
    %c0_13 = arith.constant 0 : index
    %c0_14 = arith.constant 0 : index
    %15 = vector.load %arg7[%c0_13, %c0_14] : memref<16x1xf32, #tpu.memory_space<vmem>>, vector<16x1xf32>
    %16 = vector.broadcast %15 : vector<16x1xf32> to vector<16x256xf32>
    %17 = arith.addf %14, %16 : vector<16x256xf32>
    %cst_15 = arith.constant 0.000000e+00 : f32
    %18 = vector.broadcast %cst_15 : f32 to vector<16x256xf32>
    %19 = arith.maximumf %17, %18 : vector<16x256xf32>
    %20 = arith.addf %12, %19 : vector<16x256xf32>
    %c0_16 = arith.constant 0 : index
    %c0_17 = arith.constant 0 : index
    %c0_18 = arith.constant 0 : index
    %21 = vector.load %arg8[%c0_16, %c0_17, %c0_18] : memref<1x16x256xf32, #tpu.memory_space<vmem>>, vector<1x16x256xf32>
    %22 = vector.shape_cast %21 : vector<1x16x256xf32> to vector<16x256xf32>
    %23 = vector.shape_cast %20 : vector<16x256xf32> to vector<1x16x256xf32>
    tpu.vector_store %arg8[%c0_16, %c0_17, %c0_18], %23 {strides = array<i32>} : memref<1x16x256xf32, #tpu.memory_space<vmem>>, vector<1x16x256xf32>,
    return
  }
  func.func @transform_0(%arg0: i32, %arg1: i32) -> (i32, i32, i32) {
    %c0_i32 = arith.constant 0 : i32
    %c0_i32_0 = arith.constant 0 : i32
    return %arg0, %c0_i32, %arg1 : i32, i32, i32
  }
  func.func @transform_1(%arg0: i32, %arg1: i32) -> (i32, i32, i32) {
    %c0_i32 = arith.constant 0 : i32
    %c0_i32_0 = arith.constant 0 : i32
    return %arg0, %c0_i32, %arg1 : i32, i32, i32
  }
  func.func @transform_2(%arg0: i32, %arg1: i32) -> (i32, i32) {
    %c0_i32 = arith.constant 0 : i32
    %c0_i32_0 = arith.constant 0 : i32
    %c0_i32_1 = arith.constant 0 : i32
    return %c0_i32, %c0_i32_0 : i32, i32
  }
  func.func @transform_3(%arg0: i32, %arg1: i32) -> (i32, i32) {
    %c0_i32 = arith.constant 0 : i32
    %c0_i32_0 = arith.constant 0 : i32
    %c0_i32_1 = arith.constant 0 : i32
    return %c0_i32, %c0_i32_0 : i32, i32
  }
  func.func @transform_4(%arg0: i32, %arg1: i32) -> (i32, i32) {
    %c0_i32 = arith.constant 0 : i32
    %c0_i32_0 = arith.constant 0 : i32
    %c0_i32_1 = arith.constant 0 : i32
    return %c0_i32, %c0_i32_0 : i32, i32
  }
  func.func @transform_5(%arg0: i32, %arg1: i32) -> (i32, i32) {
    %c0_i32 = arith.constant 0 : i32
    %c0_i32_0 = arith.constant 0 : i32
    %c0_i32_1 = arith.constant 0 : i32
    return %c0_i32, %c0_i32_0 : i32, i32
  }
  func.func @transform_6(%arg0: i32, %arg1: i32) -> (i32, i32, i32) {
    %c0_i32 = arith.constant 0 : i32
    %c0_i32_0 = arith.constant 0 : i32
    return %arg0, %c0_i32, %arg1 : i32, i32, i32
  }
}

</mosaic_0001>

<bundles_post_ra>
// kernel: tpu_custom_call.1
= control target key start
LH: loop header
LB: loop body
LE: loop exit
PB: predicated region body
PF: predicated region fallthrough
CT: control target
= control target key end

     0   :  { %11 = vsyncpa [#allocation3], 0  ;;  %s949_s0 = inlined_call_operand.vmem [shape: f32[2,4,256], index: 0, kind: input, shape index: {}]   ;;  %s950_s1 = inlined_call_operand.vmem [shape: f32[2,8,256], index: 1, kind: input, shape index: {}]   ;;  %s951_s2 = inlined_call_operand.vmem [shape: bf16[16,4], index: 2, kind: input, shape index: {}]   ;;  %s952_s3 = inlined_call_operand.vmem [shape: bf16[16,8], index: 3, kind: input, shape index: {}]   ;;  %s953_s4 = inlined_call_operand.vmem [shape: f32[16,1], index: 4, kind: input, shape index: {}]   ;;  %s954_s5 = inlined_call_operand.vmem [shape: f32[16,1], index: 5, kind: input, shape index: {}]   ;;  %s955_s6 = inlined_call_operand.hbm [shape: f32[2,16,256], index: 6, kind: output, shape index: {}]  }
   0x1   :  { %13 = vsyncpa [#allocation3 + $0x1], 0  ;;  %s809_s21 = smov 0   ;;  %s811_s22 = smov 0  }
   0x2   :  { %s813_s23 = smov 0   ;;  %s815_s24 = smov 0  }
   0x3   :  { %s817_s25 = smov 0   ;;  %s819_s26 = smov 0  }
   0x4 LB: > { %s603_s27 = sadd.s32 4294967295, %s768_s26   ;;  %s604_s28 = sadd.s32 4294967294, %s768_s26   ;;  %s768_s26 = sphi %s819_s26, %s19_s26   ;;  %s764_s25 = sphi %s817_s25, %s965_s25   ;;  %s760_s24 = sphi %s815_s24, %s964_s24   ;;  %s756_s23 = sphi %s813_s23, %s963_s23   ;;  %s752_s22 = sphi %s811_s22, %s962_s22   ;;  %s748_s21 = sphi %s809_s21, %s961_s21  }
   0x5   : > { %s31_s29 = sadd.s32 1, %s764_s25  ;;  %s180_s30 = sadd.s32 1, %s756_s23 }
   0x6   : > { %p33_p0 = scmp.ge.s32.totalorder %s31_s29, 2  ;;  %p190_p1 = scmp.ne.s32.totalorder %s756_s23, %s752_s22 }
   0x7   : > { %p191_p2 = scmp.eq.s32.totalorder %s603_s27, 1  ;;  %p196_p3 = scmp.ne.s32.totalorder %s752_s22, %s748_s21 }
   0x8   : > { %s967_s29 = smov (%p33_p0, %s31_s29), 0  ;;  %p197_p5 = scmp.eq.s32.totalorder %s604_s28, 1 }
   0x9   : > { %957 = sst [smem:[#allocation5_spill]] %s967_s29  ;;  %p849_p4 = por %p191_p2, %p190_p1 }
   0xa   : > { %s175_s8 = ssub.s32 %s764_s25, %s967_s29  ;;  %p607_p6 = scmp.ge.s32.totalorder %s768_s26, 1 }
   0xb   : > { %p178_p7 = scmp.eq.s32.totalorder %s175_s8, 0  ;;  %p856_p8 = por %p197_p5, %p196_p3 }
   0xc   : > { %p253_p9 = scmp.lt.s32.totalorder %s768_s26, 3 }
   0xd   : > { %s862_s10 = scalar_select %p178_p7, %s756_s23, %s180_s30  }
   0xe   : > { %p254_p10 = pnand %p607_p6, %p253_p9 }
   0xf   : > { %p297_p11 = scmp.lt.s32.totalorder (!%p254_p10), %s760_s24, 1  ;;  %v770_v0 = vmov (!%p254_p10), 0   ;;  %v407_v1 = vld [vmem:[%s954_s5] sm:$0xff] (!%p254_p10)  ;;  %v408_v3 = vld [vmem:[%s954_s5 + $0x8] sm:$0xff] (!%p254_p10)  ;;  %vm428_vm0 = vcmask (!%p254_p10), 1043456   ;;  %vm351_vm1 = vcmask (!%p254_p10), 1041408  }
  0x10   : > { %257 = sbr.rel (%p254_p10) target bundleno = 273 (0x111), region = 44  ;;  %467 = vmatprep.mubr.bf16.mxu1 (!%p254_p10), %v770_v0  ;;  %390 = vmatprep.mubr.bf16.mxu0 (!%p254_p10), %v770_v0  ;;  %v330_v2 = vld [vmem:[%s953_s4] sm:$0xff] (!%p254_p10)  ;;  %v331_v4 = vld [vmem:[%s953_s4 + $0x8] sm:$0xff] (!%p254_p10)  ;;  %vm424_vm2 = vcmask (!%p254_p10), 64512   ;;  %vm347_vm3 = vcmask (!%p254_p10), 31744   ;;  %s626_s20 = sshll.u32 (!%p254_p10), %s760_s24, 9 }
  0x11   : > { %686 = vset.pattern.permute.xlu1 (!%p254_p10), %v770_v0  ;;  %685 = vset.pattern.permute.xlu0 (!%p254_p10), %v770_v0  ;;  %v688_v15 = vld [vmem:[%s952_s3] sm:$0xff] (!%p254_p10)   ;;  %s899_s30 = scalar_lea.hbm (!%p254_p10), %s955_s6, %s626_s20 }
  0x12   : > { %411 = vperm.xlu1 (!%p254_p10), %686, %v407_v1   ;;  %334 = vperm.xlu0 (!%p254_p10), %685, %v330_v2   ;;  %v689_v16 = vld [vmem:[%s951_s2] sm:$0xff] (!%p254_p10)  }
  0x16   : > { %416 = vperm.xlu1 (!%p254_p10), %686, %v408_v3   ;;  %339 = vperm.xlu0 (!%p254_p10), %685, %v331_v4  }
  0x17   : > { %s298_s11 = scalar_select %p297_p11, %s760_s24, 1 }
  0x19   : > { %s625_s16 = sshll.u32 %s298_s11, 4  ;;  %s624_s17 = sshll.u32 %s298_s11, 3 }
  0x1a   : > { %s314_s28 = scalar_lea.vmem %s950_s1, %s625_s16  ;;  %s304_s12 = scalar_lea.vmem %s949_s0, %s624_s17 }
  0x1b   : > { %v325_v5 = vld [vmem:[%s314_s28 + $0x8] sm:$0xff]  ;;  %v324_v6 = vld [vmem:[%s314_s28] sm:$0xff]  ;;  %s293_s16 = sand.u32 1, %s752_s22  }
  0x1c   : > { %v318_v7 = vld [vmem:[%s304_s12] sm:$0xff]  ;;  %v327_v8 = vpack.c.bf16 %v325_v5, %v325_v5  ;;  %v326_v9 = vpack.c.bf16 %v324_v6, %v324_v6  ;;  %s608_s17 = sshll.u32 %s293_s16, 5  ;;  %s903_s24 = scalar_lea.sflag [#allocation3], %s293_s16 }
  0x1d   : > { %v320_v10 = vcombine.high %v318_v7, %v318_v7  ;;  %v322_v11 = vpack.c.bf16 %v318_v7, %v318_v7  ;;  %s295_s18 = scalar_lea.vmem [#allocation2], %s608_s17  ;;  %s771_s12 = smov [#allocation2]  }
  0x1e   : > { %617 = vmatprep.subr.msk.bf16.mxu1 %vm428_vm0, %v327_v8  ;;  %v430_v12 = vsel %vm428_vm0, %v326_v9, 0  ;;  %s506_s19 = sshll.u32 %s295_s18, 4  ;;  %s694_s13 = sshll.u32 %s771_s12, 4  ;;  %s894_s19 = int_to_ptr.vmem [resolvable:$true] %s506_s19  ;;  %s695_s13 = int_to_ptr.vmem [resolvable:$false] %s694_s13 }
  0x1f   : > { %v323_v13 = vpack.c.bf16 %v320_v10, %v320_v10  ;;  %v353_v14 = vsel %vm351_vm1, %v322_v11, 0  ;;  %436 = vmatpush1.bf16.msra.mxu1 %v430_v12  ;;  %s690_s8 = scalar_lea.vmem %s894_s19, 512  ;;  %s696_s11 = scalar_lea.vmem %s695_s13, 1024 }
  0x20   : > { %p691_p12 = scmp.ne.s32.totalorder %s894_s19, %s690_s8  ;;  %p697_p1 = scmp.lt.s32.totalorder %s894_s19, %s695_s13 }
  0x21   : > { %614 = vmatprep.subr.msk.bf16.mxu0 %vm351_vm1, %v323_v13  ;;  %p698_p2 = scmp.lt.s32.totalorder %s696_s11, %s690_s8 }
  0x22   : > { %359 = vmatpush1.bf16.msra.mxu0 %v353_v14  ;;  %618 = vmatmul.mubr.msk.bf16.vlgmr.msra.gmra.mrb[0].mxu1 %vm424_vm2, %v688_v15  ;;  %p692_p13 = pnand %p691_p12, %p849_p4 }
  0x23   : > { %p699_p3 = por %p698_p2, %p697_p1 }
  0x24   : > { %p693_p0 = pneg %p692_p13 }
  0x25   : > { %615 = vmatmul.mubr.msk.bf16.vlgmr.msra.gmra.mrb[0].mxu0 %vm347_vm3, %v689_v16 }
  0x26   : > { %p700_p5 = pnand %p699_p3, %p693_p0 }
  0x91   : > { %v412_v17 = vpop.permute.xlu1 %411  ;;  %v335_v18 = vpop.permute.xlu0 %334 }
  0x95   : > { %v417_v20 = vpop.permute.xlu1 %416  ;;  %v340_v31 = vpop.permute.xlu0 %339 }
  0xf5   : > { %v469_v19 = vpop.f32.mrb[0].mxu1 }
  0xf6   : > { %v470_v21 = vadd.f32 %v469_v19, %v412_v17  ;;  %v471_v22 = vpop.f32.mrb[1].mxu1 }
  0xf7   : > { %v472_v23 = vadd.f32 %v471_v22, %v412_v17  ;;  %v473_v25 = vpop.f32.mrb[2].mxu1 }
  0xf8   : > { %v392_v24 = vpop.f32.mrb[0].mxu0  ;;  %v478_v26 = vmax.f32 %v470_v21, 0.0  ;;  %v474_v28 = vadd.f32 %v473_v25, %v417_v20  ;;  %v475_v30 = vpop.f32.mrb[3].mxu1 }
  0xf9   : > { %v393_v27 = vadd.f32 %v392_v24, %v335_v18  ;;  %v394_v29 = vpop.f32.mrb[1].mxu0  ;;  %v476_v33 = vadd.f32 %v475_v30, %v417_v20  ;;  %v479_v38 = vmax.f32 %v472_v23, 0.0 }
  0xfa   : > { %v395_v32 = vadd.f32 %v394_v29, %v335_v18  ;;  %v396_v34 = vpop.f32.mrb[2].mxu0  ;;  %v480_v42 = vmax.f32 %v474_v28, 0.0 }
  0xfb   : > { %v401_v35 = vmax.f32 %v393_v27, 0.0  ;;  %v397_v36 = vadd.f32 %v396_v34, %v340_v31  ;;  %v398_v37 = vpop.f32.mrb[3].mxu0  ;;  %v481_v45 = vmax.f32 %v476_v33, 0.0 }
  0xfc   : > { %v402_v39 = vmax.f32 %v395_v32, 0.0  ;;  %v399_v40 = vadd.f32 %v398_v37, %v340_v31 }
  0xfd   : > { %v482_v41 = vadd.f32 %v478_v26, %v401_v35  ;;  %v403_v43 = vmax.f32 %v397_v36, 0.0 }
  0xfe   : > { %v483_v44 = vadd.f32 %v479_v38, %v402_v39  ;;  %v404_v46 = vmax.f32 %v399_v40, 0.0 }
  0xff   : > { %486 = vst [vmem:[%s295_s18] sm:$0xff] %v482_v41  ;;  %v484_v47 = vadd.f32 %v480_v42, %v403_v43 }
 0x100   : > { %487 = vst [vmem:[%s295_s18 + $0x8] sm:$0xff] %v483_v44  ;;  %v485_v48 = vadd.f32 %v481_v45, %v404_v46 }
 0x101   : > { %488 = vst [vmem:[%s295_s18 + $0x10] sm:$0xff] %v484_v47 }
 0x102   : > { %489 = vst [vmem:[%s295_s18 + $0x18] sm:$0xff] %v485_v48 }
 0x103   : > { %703 = shalt.err (!%p700_p5)
}
 0x104   : > { %s704_s14 = scalar_lea.hbm %s899_s30, 512  ;;  %s708_s16 = scalar_lea.hbm %s955_s6, 1024 }
 0x105   : > { %p705_p6 = scmp.ne.s32.totalorder %s899_s30, %s704_s14  ;;  %p709_p10 = scmp.lt.u32.totalorder %s899_s30, %s955_s6 }
 0x106   : > { %p710_p11 = scmp.lt.u32.totalorder %s708_s16, %s704_s14  ;;  %p712_p13 = scmp.lt.u32.totalorder %s704_s14, %s899_s30 }
 0x107   : > { %p706_p7 = pnand %p705_p6, %p849_p4 }
 0x108   : > { %p711_p12 = por %p710_p11, %p709_p10 }
 0x109   : > { %p707_p9 = pneg %p706_p7 }
 0x10a   : > { %p713_p0 = por %p712_p13, %p711_p12 }
 0x10c   : > { %p714_p1 = pnand %p713_p0, %p707_p9 }
 0x10e   : > { %717 = shalt.err (!%p714_p1)
}
 0x10f   : > { %s772_s20 = smov 256   ;;  %s773_s27 = smov 16  }
 0x110   : > { %627 = dma.vmem_to_hbm [thread:$0]  (%p849_p4), %s894_s19, 512, %s899_s30, %s903_s24, %s772_s20, %s772_s20, %s773_s27  }
 0x111 PF: > { %p633_p2 = scmp.ge.s32.totalorder %s768_s26, 2  ;;  %s521_s28 = sand.u32 1, %s748_s21  }
 0x112   : > { %s522_s8 = scalar_lea.sflag [#allocation3], %s521_s28 }
 0x113   : > { %p630_p3 = pnand %p633_p2, %p856_p8 }
 0x115   : > { %743 = dma.done.wait (!%p630_p3), %s522_s8, 512  }
 0x116   : > { %745 = vsyncadd (!%p630_p3), %s522_s8, 4294966784  ;;  %s19_s26 = sadd.s32 1, %s768_s26   ;;  %s960_s7 = sld [smem:[#allocation5_spill]] }
 0x117   : > { %p16_p5 = scmp.ge.s32.totalorder %s19_s26, 4   ;;  %s961_s21 = smov %s752_s22 }
 0x118   : > { %s962_s22 = smov %s756_s23  ;;  %s963_s23 = smov %s862_s10 }
 0x119   : > { %s964_s24 = smov %s764_s25  ;;  %18 = sbr.rel (!%p16_p5) target bundleno = 4 (0x4), region = 82 }
 0x11c   : > { %s965_s25 = smov %s960_s7 }
 0x120   :  { %527 = vsyncpa [#allocation3], 1 }
 0x121   :  { %529 = vsyncpa [#allocation3 + $0x1], 1 }

</bundles_post_ra>
